<compile_context>
chip_gen: v7x
topology: tpu7x:2x2x1
jax: 0.10.0
libtpu: 0.0.40
codegen_flags: <defaults>
</compile_context>

<pallas_src>
import math
import functools

import jax
import jax.numpy as jnp
from jax.experimental import pallas as pl
from jax.experimental.pallas import tpu as pltpu


# ---------------------------------------------------------------------------
# Tile selection (no padding: tiles are exact divisors or the full dim)
# ---------------------------------------------------------------------------

def _pick_tile(dim, cap, mult):
    """Largest divisor of `dim` that is a multiple of `mult` and <= cap; else full dim."""
    if dim <= cap:
        return dim
    for t in range(cap, mult - 1, -mult):
        if dim % t == 0:
            return t
    return dim  # fall back to full dim (valid BlockSpec: equals array dim)


# ---------------------------------------------------------------------------
# Fused matmul kernel: [LN(x)] @ W (+ bias) (+ ReLU) (+ [LN(residual)])
# ---------------------------------------------------------------------------

def _matmul_kernel(*refs, has_bias, has_res, relu, has_xln, has_resln):
    it = iter(refs)
    x_ref = next(it)
    w_ref = next(it)
    b_ref = next(it) if has_bias else None
    r_ref = next(it) if has_res else None
    xg_ref = next(it) if has_xln else None
    xb_ref = next(it) if has_xln else None
    rg_ref = next(it) if has_resln else None
    rb_ref = next(it) if has_resln else None
    o_ref = next(it)
    acc_ref = next(it)

    k = pl.program_id(2)

    @pl.when(k == 0)
    def _init():
        acc_ref[...] = jnp.zeros_like(acc_ref)

    x = x_ref[...]
    if has_xln:  # prologue LayerNorm over full K (only emitted when tk == K)
        xf = x.astype(jnp.float32)
        mu = jnp.mean(xf, axis=-1, keepdims=True)
        xc = xf - mu
        var = jnp.mean(xc * xc, axis=-1, keepdims=True)
        x = (xc * jax.lax.rsqrt(var + 1e-5)
             * xg_ref[...].astype(jnp.float32) + xb_ref[...].astype(jnp.float32))
    # bf16 MXU operands, f32 accumulation.
    acc_ref[...] += jnp.dot(x.astype(jnp.bfloat16),
                            w_ref[...].astype(jnp.bfloat16),
                            preferred_element_type=jnp.float32)

    @pl.when(k == pl.num_programs(2) - 1)
    def _finish():
        acc = acc_ref[...]
        if has_bias:
            acc = acc + b_ref[...].astype(jnp.float32)
        if relu:
            acc = jnp.maximum(acc, 0.0)
        if has_res:
            r = r_ref[...].astype(jnp.float32)
            if has_resln:  # epilogue LayerNorm over full N (only when tn == N)
                mu = jnp.mean(r, axis=-1, keepdims=True)
                rc = r - mu
                var = jnp.mean(rc * rc, axis=-1, keepdims=True)
                r = (rc * jax.lax.rsqrt(var + 1e-5)
                     * rg_ref[...].astype(jnp.float32) + rb_ref[...].astype(jnp.float32))
            acc = acc + r
        o_ref[...] = acc.astype(o_ref.dtype)


def linear(x, w, b=None, *, relu=False, residual=None, x_ln=None, res_ln=None,
           out_dtype=None):
    """out = [LN(residual)] + relu?( [LN(x)] @ w + b )

    x: (M, K); w: (K, N) pre-transposed (bf16 ok); b: (1, N) or None;
    residual: (M, N) or None; x_ln / res_ln: (gamma(1,K|N), beta(1,K|N)) or None.
    """
    M, K = x.shape
    Kw, N = w.shape
    assert Kw == K
    out_dtype = out_dtype or x.dtype

    tm = _pick_tile(M, 512, 8)
    tn = _pick_tile(N, 512, 128)
    tk = _pick_tile(K, 512, 128)

    # LN fusion requires the full reduction axis inside one block; else fall back.
    if x_ln is not None and tk != K:
        x = layer_norm_2d(x, x_ln[0], x_ln[1])
        x_ln = None
    if res_ln is not None and residual is not None and tn != N:
        residual = layer_norm_2d(residual, res_ln[0], res_ln[1])
        res_ln = None

    operands = [x, w]
    in_specs = [
        pl.BlockSpec((tm, tk), lambda i, j, k: (i, k)),
        pl.BlockSpec((tk, tn), lambda i, j, k: (k, j)),
    ]
    if b is not None:
        operands.append(b)
        in_specs.append(pl.BlockSpec((1, tn), lambda i, j, k: (0, j)))
    if residual is not None:
        operands.append(residual)
        in_specs.append(pl.BlockSpec((tm, tn), lambda i, j, k: (i, j)))
    if x_ln is not None:
        operands += [x_ln[0], x_ln[1]]
        in_specs += [pl.BlockSpec((1, tk), lambda i, j, k: (0, k)),
                     pl.BlockSpec((1, tk), lambda i, j, k: (0, k))]
    if res_ln is not None:
        operands += [res_ln[0], res_ln[1]]
        in_specs += [pl.BlockSpec((1, tn), lambda i, j, k: (0, j)),
                     pl.BlockSpec((1, tn), lambda i, j, k: (0, j))]

    return pl.pallas_call(
        functools.partial(_matmul_kernel,
                          has_bias=b is not None, has_res=residual is not None,
                          relu=relu, has_xln=x_ln is not None,
                          has_resln=res_ln is not None),
        out_shape=jax.ShapeDtypeStruct((M, N), out_dtype),
        grid=(M // tm, N // tn, K // tk),
        in_specs=in_specs,
        out_specs=pl.BlockSpec((tm, tn), lambda i, j, k: (i, j)),
        scratch_shapes=[pltpu.VMEM((tm, tn), jnp.float32)],
        compiler_params=pltpu.CompilerParams(
            dimension_semantics=("parallel", "parallel", "arbitrary"),
            vmem_limit_bytes=32 * 1024 * 1024),
    )(*operands)


# ---------------------------------------------------------------------------
# Standalone LayerNorm (fallback only — all LNs are fused at these sizes)
# ---------------------------------------------------------------------------

def _layernorm_kernel(x_ref, w_ref, b_ref, o_ref):
    x = x_ref[...].astype(jnp.float32)
    mean = jnp.mean(x, axis=-1, keepdims=True)
    xc = x - mean
    var = jnp.mean(xc * xc, axis=-1, keepdims=True)
    xn = xc * jax.lax.rsqrt(var + 1e-5)
    o_ref[...] = (xn * w_ref[...].astype(jnp.float32)
                  + b_ref[...].astype(jnp.float32)).astype(o_ref.dtype)


def layer_norm_2d(x2d, weight, bias):
    """x2d: (M, C); weight/bias: (1, C)."""
    M, C = x2d.shape
    tm = _pick_tile(M, 1024, 8)
    return pl.pallas_call(
        _layernorm_kernel,
        out_shape=jax.ShapeDtypeStruct((M, C), x2d.dtype),
        grid=(M // tm,),
        in_specs=[pl.BlockSpec((tm, C), lambda i: (i, 0)),
                  pl.BlockSpec((1, C), lambda i: (0, 0)),
                  pl.BlockSpec((1, C), lambda i: (0, 0))],
        out_specs=pl.BlockSpec((tm, C), lambda i: (i, 0)),
        compiler_params=pltpu.CompilerParams(dimension_semantics=("parallel",)),
    )(x2d, weight, bias)


# ---------------------------------------------------------------------------
# Attention kernels (packed QKV / packed KV, per-head inside the kernel)
# ---------------------------------------------------------------------------

def _softmax_pv(s, v_head, out_dtype):
    s = s - jnp.max(s, axis=-1, keepdims=True)
    p = jnp.exp(s)
    p = p * pl.reciprocal(jnp.sum(p, axis=-1, keepdims=True), approx=True)
    return jnp.dot(p.astype(jnp.bfloat16), v_head,
                   preferred_element_type=jnp.float32).astype(out_dtype)


def _self_attn_kernel(qkv_ref, o_ref, *, n_head, causal, scale):
    # qkv_ref: (1, T, 3C) packed, o_ref: (1, T, C); lane-dense blocks.
    T = o_ref.shape[1]
    C = o_ref.shape[2]
    hd = C // n_head

    q = (qkv_ref[0, :, 0:C].astype(jnp.float32) * scale).astype(jnp.bfloat16)
    k = qkv_ref[0, :, C:2 * C].astype(jnp.bfloat16)
    v = qkv_ref[0, :, 2 * C:3 * C].astype(jnp.bfloat16)

    if causal:
        row = jax.lax.broadcasted_iota(jnp.int32, (T, T), 0)
        col = jax.lax.broadcasted_iota(jnp.int32, (T, T), 1)
        keep = col <= row

    for h in range(n_head):                      # static unroll over heads
        lo = h * hd
        s = jax.lax.dot_general(q[:, lo:lo + hd], k[:, lo:lo + hd],
                                (((1,), (1,)), ((), ())),
                                preferred_element_type=jnp.float32)
        if causal:
            s = jnp.where(keep, s, -1e30)        # finite mask (NaN-safe)
        o_ref[0, :, lo:lo + hd] = _softmax_pv(s, v[:, lo:lo + hd], o_ref.dtype)


def _cross_attn_kernel(q_ref, kv_ref, o_ref, *, n_head, scale):
    # q_ref: (1, Tq, C), kv_ref: (1, Tk, 2C) packed, o_ref: (1, Tq, C).
    C = o_ref.shape[2]
    hd = C // n_head

    q = (q_ref[0].astype(jnp.float32) * scale).astype(jnp.bfloat16)
    k = kv_ref[0, :, 0:C].astype(jnp.bfloat16)
    v = kv_ref[0, :, C:2 * C].astype(jnp.bfloat16)

    for h in range(n_head):
        lo = h * hd
        s = jax.lax.dot_general(q[:, lo:lo + hd], k[:, lo:lo + hd],
                                (((1,), (1,)), ((), ())),
                                preferred_element_type=jnp.float32)
        o_ref[0, :, lo:lo + hd] = _softmax_pv(s, v[:, lo:lo + hd], o_ref.dtype)


def self_attention_btc(qkv, *, n_head, causal, out_dtype):
    """qkv: (B, T, 3C) packed -> (B, T, C)."""
    B, T, C3 = qkv.shape
    C = C3 // 3
    scale = 1.0 / math.sqrt(C // n_head)
    return pl.pallas_call(
        functools.partial(_self_attn_kernel, n_head=n_head, causal=causal, scale=scale),
        out_shape=jax.ShapeDtypeStruct((B, T, C), out_dtype),
        grid=(B,),
        in_specs=[pl.BlockSpec((1, T, C3), lambda b: (b, 0, 0))],
        out_specs=pl.BlockSpec((1, T, C), lambda b: (b, 0, 0)),
        compiler_params=pltpu.CompilerParams(dimension_semantics=("parallel",)),
    )(qkv)


def cross_attention_btc(q, kv, *, n_head, out_dtype):
    """q: (B, Tq, C), kv: (B, Tk, 2C) packed -> (B, Tq, C)."""
    B, Tq, C = q.shape
    Tk = kv.shape[1]
    scale = 1.0 / math.sqrt(C // n_head)
    return pl.pallas_call(
        functools.partial(_cross_attn_kernel, n_head=n_head, scale=scale),
        out_shape=jax.ShapeDtypeStruct((B, Tq, C), out_dtype),
        grid=(B,),
        in_specs=[pl.BlockSpec((1, Tq, C), lambda b: (b, 0, 0)),
                  pl.BlockSpec((1, Tk, 2 * C), lambda b: (b, 0, 0))],
        out_specs=pl.BlockSpec((1, Tq, C), lambda b: (b, 0, 0)),
        compiler_params=pltpu.CompilerParams(dimension_semantics=("parallel",)),
    )(q, kv)


# ---------------------------------------------------------------------------
# Model glue (plain JAX around the Pallas kernels); dropout = identity (eval)
# ---------------------------------------------------------------------------

def encoder_layer(p, x, n_head):
    B, T, C = x.shape
    M = B * T
    x2d = x.reshape(M, C)
    # x1 = LN1(x); x2 = x1 + proj(attn(qkv(x1)))          (LN fused both sides)
    qkv = linear(x2d, p["attn"]["w_qkv"], p["attn"]["b_qkv"],
                 x_ln=(p["ln1_w"], p["ln1_b"]), out_dtype=jnp.bfloat16)
    y = self_attention_btc(qkv.reshape(B, T, 3 * C), n_head=n_head, causal=False,
                           out_dtype=jnp.bfloat16)
    x2d = linear(y.reshape(M, C), p["attn"]["w_proj"], p["attn"]["b_proj"],
                 residual=x2d, res_ln=(p["ln1_w"], p["ln1_b"]), out_dtype=jnp.float32)
    # x3 = LN2(x2); x4 = x3 + proj(relu(fc(x3)))
    h = linear(x2d, p["mlp"]["w_fc"], p["mlp"]["b_fc"], relu=True,
               x_ln=(p["ln2_w"], p["ln2_b"]), out_dtype=jnp.bfloat16)
    x2d = linear(h, p["mlp"]["w_proj"], p["mlp"]["b_proj"],
                 residual=x2d, res_ln=(p["ln2_w"], p["ln2_b"]), out_dtype=jnp.float32)
    return x2d.reshape(B, T, C)


def decoder_layer(p, x, enc_pre, enc_ln, n_head):
    B, T, C = x.shape
    M = B * T
    Tk = enc_pre.shape[1]
    x2d = x.reshape(M, C)
    enc2d = enc_pre.reshape(B * Tk, C)
    # masked self-attention block
    qkv = linear(x2d, p["m_attn"]["w_qkv"], p["m_attn"]["b_qkv"],
                 x_ln=(p["ln1_w"], p["ln1_b"]), out_dtype=jnp.bfloat16)
    y = self_attention_btc(qkv.reshape(B, T, 3 * C), n_head=n_head, causal=True,
                           out_dtype=jnp.bfloat16)
    x2d = linear(y.reshape(M, C), p["m_attn"]["w_proj"], p["m_attn"]["b_proj"],
                 residual=x2d, res_ln=(p["ln1_w"], p["ln1_b"]), out_dtype=jnp.float32)
    # cross-attention block (encoder final norm fused into the KV projection)
    q = linear(x2d, p["attn"]["w_q"], p["attn"]["b_q"],
               x_ln=(p["ln2_w"], p["ln2_b"]), out_dtype=jnp.bfloat16)
    kv = linear(enc2d, p["attn"]["w_kv"], p["attn"]["b_kv"],
                x_ln=enc_ln, out_dtype=jnp.bfloat16)
    y = cross_attention_btc(q.reshape(B, T, C), kv.reshape(B, Tk, 2 * C),
                            n_head=n_head, out_dtype=jnp.bfloat16)
    x2d = linear(y.reshape(M, C), p["attn"]["w_proj"], p["attn"]["b_proj"],
                 residual=x2d, res_ln=(p["ln2_w"], p["ln2_b"]), out_dtype=jnp.float32)
    # MLP block
    h = linear(x2d, p["mlp"]["w_fc"], p["mlp"]["b_fc"], relu=True,
               x_ln=(p["ln3_w"], p["ln3_b"]), out_dtype=jnp.bfloat16)
    x2d = linear(h, p["mlp"]["w_proj"], p["mlp"]["b_proj"],
                 residual=x2d, res_ln=(p["ln3_w"], p["ln3_b"]), out_dtype=jnp.float32)
    return x2d.reshape(B, T, C)


def positional_encoding(block_size, n_embd):
    pos = jnp.arange(block_size, dtype=jnp.float32)[:, None]
    div_term = jnp.exp(jnp.arange(0, n_embd, 2, dtype=jnp.float32)
                       * -(math.log(10000.0) / n_embd))
    pe = jnp.zeros((block_size, n_embd), dtype=jnp.float32)
    pe = pe.at[:, 0::2].set(jnp.sin(pos * div_term))
    pe = pe.at[:, 1::2].set(jnp.cos(pos * div_term))
    return pe


def transformer_forward(params, idx, config):
    B, T = idx.shape
    assert T <= config["block_size"]
    # Token embedding gather + positional encoding (XLA glue, not a hot matmul).
    x = params["wte"][idx] + params["pe"][None, :T, :]          # (B, T, C) f32
    # Encoder (final encoder norm is fused into the decoder's KV projections).
    enc_pre = x
    for lp in params["encoder_layers"]:
        enc_pre = encoder_layer(lp, enc_pre, config["n_head"])
    enc_ln = (params["enc_norm_w"], params["enc_norm_b"])
    # Decoder.
    dec = x
    for lp in params["decoder_layers"]:
        dec = decoder_layer(lp, dec, enc_pre, enc_ln, config["n_head"])
    # Final decoder norm fused into lm_head; last token only (targets=None path).
    last = dec[:, -1, :]                                         # (B, C)
    logits = linear(last, params["lm_head_w"],
                    x_ln=(params["dec_norm_w"], params["dec_norm_b"]))
    return logits.reshape(B, 1, config["vocab_size"])


# ---------------------------------------------------------------------------
# Parameters (weights pre-transposed (in,out), pre-cast bf16; biases/LN as (1,N) f32)
# ---------------------------------------------------------------------------

def _normal(key, shape, std=0.02):
    return jax.random.normal(key, shape, dtype=jnp.float32) * std


def make_self_attn_params(key, C):
    ks = jax.random.split(key, 4)
    wq, wk, wv = (_normal(k, (C, C)) for k in ks[:3])
    return dict(
        w_qkv=jnp.concatenate([wq, wk, wv], axis=1).astype(jnp.bfloat16),   # (C, 3C)
        b_qkv=jnp.zeros((1, 3 * C), jnp.float32),
        w_proj=_normal(ks[3], (C, C)).astype(jnp.bfloat16),
        b_proj=jnp.zeros((1, C), jnp.float32))


def make_cross_attn_params(key, C):
    ks = jax.random.split(key, 4)
    return dict(
        w_q=_normal(ks[0], (C, C)).astype(jnp.bfloat16),
        b_q=jnp.zeros((1, C), jnp.float32),
        w_kv=jnp.concatenate([_normal(ks[1], (C, C)), _normal(ks[2], (C, C))],
                             axis=1).astype(jnp.bfloat16),                  # (C, 2C)
        b_kv=jnp.zeros((1, 2 * C), jnp.float32),
        w_proj=_normal(ks[3], (C, C)).astype(jnp.bfloat16),
        b_proj=jnp.zeros((1, C), jnp.float32))


def make_mlp_params(key, C):
    ks = jax.random.split(key, 2)
    return dict(
        w_fc=_normal(ks[0], (C, 4 * C)).astype(jnp.bfloat16),
        b_fc=jnp.zeros((1, 4 * C), jnp.float32),
        w_proj=_normal(ks[1], (4 * C, C)).astype(jnp.bfloat16),
        b_proj=jnp.zeros((1, C), jnp.float32))


def _ln_params(C):
    return jnp.ones((1, C), jnp.float32), jnp.zeros((1, C), jnp.float32)


def make_params(key, config):
    C = config["n_embd"]
    keys = jax.random.split(key, 2 + 2 * config["n_layer"] + 1)
    enc_layers, dec_layers = [], []
    for li in range(config["n_layer"]):
        k_enc = jax.random.split(keys[2 + li], 2)
        w1, b1 = _ln_params(C)
        w2, b2 = _ln_params(C)
        enc_layers.append(dict(
            ln1_w=w1, ln1_b=b1, ln2_w=w2, ln2_b=b2,
            attn=make_self_attn_params(k_enc[0], C),
            mlp=make_mlp_params(k_enc[1], C)))
        k_dec = jax.random.split(keys[2 + config["n_layer"] + li], 3)
        w1, b1 = _ln_params(C)
        w2, b2 = _ln_params(C)
        w3, b3 = _ln_params(C)
        dec_layers.append(dict(
            ln1_w=w1, ln1_b=b1, ln2_w=w2, ln2_b=b2, ln3_w=w3, ln3_b=b3,
            m_attn=make_self_attn_params(k_dec[0], C),
            attn=make_cross_attn_params(k_dec[1], C),
            mlp=make_mlp_params(k_dec[2], C)))
    enc_nw, enc_nb = _ln_params(C)
    dec_nw, dec_nb = _ln_params(C)
    return dict(
        wte=_normal(keys[0], (config["vocab_size"], C)),
        pe=positional_encoding(config["block_size"], C),
        encoder_layers=enc_layers,
        decoder_layers=dec_layers,
        enc_norm_w=enc_nw, enc_norm_b=enc_nb,
        dec_norm_w=dec_nw, dec_norm_b=dec_nb,
        lm_head_w=_normal(keys[-1], (C, config["vocab_size"])).astype(jnp.bfloat16))


# ---------------------------------------------------------------------------
# Main
# ---------------------------------------------------------------------------

if __name__ == "__main__":
    config = dict(vocab_size=64, block_size=16, n_layer=2, n_head=4,
                  n_embd=32, dropout=0.0, bias=True)

    key = jax.random.PRNGKey(0)
    k_params, k_idx = jax.random.split(key)
    params = make_params(k_params, config)

    B, T = 2, 8
    idx = jax.random.randint(k_idx, (B, T), 0, config["vocab_size"], dtype=jnp.int32)

    logits = transformer_forward(params, idx, config)
    logits = jax.block_until_ready(logits)
    assert logits.shape == (B, 1, config["vocab_size"])
    assert bool(jnp.all(jnp.isfinite(logits)))
    print("KERNEL_OK")
</pallas_src>

<mosaic_0001>
module attributes {stable_mosaic.version = 11 : i64} {
  func.func @_matmul_kernel(%arg0: i32, %arg1: i32, %arg2: i32, %arg3: memref<16x32xf32, #tpu.memory_space<vmem>>, %arg4: memref<32x96xbf16, #tpu.memory_space<vmem>>, %arg5: memref<1x96xf32, #tpu.memory_space<vmem>>, %arg6: memref<1x32xf32, #tpu.memory_space<vmem>>, %arg7: memref<1x32xf32, #tpu.memory_space<vmem>>, %arg8: memref<16x96xbf16, #tpu.memory_space<vmem>>, %arg9: memref<16x96xf32, #tpu.memory_space<vmem>>) attributes {dimension_semantics = [#tpu.dimension_semantics<parallel>, #tpu.dimension_semantics<parallel>, #tpu.dimension_semantics<arbitrary>], iteration_bounds = array<i64: 1, 1, 1>, scalar_prefetch = 0 : i64, scratch_operands = 1 : i64, tpu.core_type = #tpu.core_type<tc>, window_params = [{transform_indices = @transform_0, window_bounds = array<i64: 16, 32>}, {transform_indices = @transform_1, window_bounds = array<i64: 32, 96>}, {transform_indices = @transform_2, window_bounds = array<i64: 1, 96>}, {transform_indices = @transform_3, window_bounds = array<i64: 1, 32>}, {transform_indices = @transform_4, window_bounds = array<i64: 1, 32>}, {transform_indices = @transform_5, window_bounds = array<i64: 16, 96>}]} {
    %c0_i32 = arith.constant 0 : i32
    %0 = arith.cmpi eq, %arg2, %c0_i32 : i32
    %1 = arith.extui %0 : i1 to i32
    %c0_i32_0 = arith.constant 0 : i32
    %2 = arith.cmpi ne, %1, %c0_i32_0 : i32
    scf.if %2 {
      %cst_19 = arith.constant 0.000000e+00 : f32
      %35 = vector.broadcast %cst_19 : f32 to vector<16x96xf32>
      %c0_20 = arith.constant 0 : index
      %c0_21 = arith.constant 0 : index
      %36 = vector.load %arg9[%c0_20, %c0_21] : memref<16x96xf32, #tpu.memory_space<vmem>>, vector<16x96xf32>
      tpu.vector_store %arg9[%c0_20, %c0_21], %35 {strides = array<i32>} : memref<16x96xf32, #tpu.memory_space<vmem>>, vector<16x96xf32>,
    } else {
    }
    %c0 = arith.constant 0 : index
    %c0_1 = arith.constant 0 : index
    %3 = vector.load %arg3[%c0, %c0_1] : memref<16x32xf32, #tpu.memory_space<vmem>>, vector<16x32xf32>
    %cst = arith.constant dense<0.000000e+00> : vector<16xf32>
    %4 = vector.multi_reduction <add>, %3, %cst [1] : vector<16x32xf32> to vector<16xf32>
    %5 = vector.shape_cast %4 : vector<16xf32> to vector<16x1xf32>
    %cst_2 = arith.constant 3.200000e+01 : f32
    %6 = vector.broadcast %cst_2 : f32 to vector<16x1xf32>
    %7 = arith.divf %5, %6 : vector<16x1xf32>
    %8 = vector.broadcast %7 : vector<16x1xf32> to vector<16x32xf32>
    %9 = arith.subf %3, %8 : vector<16x32xf32>
    %10 = arith.mulf %9, %9 : vector<16x32xf32>
    %cst_3 = arith.constant dense<0.000000e+00> : vector<16xf32>
    %11 = vector.multi_reduction <add>, %10, %cst_3 [1] : vector<16x32xf32> to vector<16xf32>
    %12 = vector.shape_cast %11 : vector<16xf32> to vector<16x1xf32>
    %cst_4 = arith.constant 3.200000e+01 : f32
    %13 = vector.broadcast %cst_4 : f32 to vector<16x1xf32>
    %14 = arith.divf %12, %13 : vector<16x1xf32>
    %cst_5 = arith.constant 9.99999974E-6 : f32
    %15 = vector.broadcast %cst_5 : f32 to vector<16x1xf32>
    %16 = arith.addf %14, %15 : vector<16x1xf32>
    %17 = math.rsqrt %16 : vector<16x1xf32>
    %18 = vector.broadcast %17 : vector<16x1xf32> to vector<16x32xf32>
    %19 = arith.mulf %9, %18 : vector<16x32xf32>
    %c0_6 = arith.constant 0 : index
    %c0_7 = arith.constant 0 : index
    %20 = vector.load %arg6[%c0_6, %c0_7] : memref<1x32xf32, #tpu.memory_space<vmem>>, vector<1x32xf32>
    %21 = vector.broadcast %20 : vector<1x32xf32> to vector<16x32xf32>
    %22 = arith.mulf %19, %21 : vector<16x32xf32>
    %c0_8 = arith.constant 0 : index
    %c0_9 = arith.constant 0 : index
    %23 = vector.load %arg7[%c0_8, %c0_9] : memref<1x32xf32, #tpu.memory_space<vmem>>, vector<1x32xf32>
    %24 = vector.broadcast %23 : vector<1x32xf32> to vector<16x32xf32>
    %25 = arith.addf %22, %24 : vector<16x32xf32>
    %c0_10 = arith.constant 0 : index
    %c0_11 = arith.constant 0 : index
    %26 = vector.load %arg9[%c0_10, %c0_11] : memref<16x96xf32, #tpu.memory_space<vmem>>, vector<16x96xf32>
    %27 = arith.truncf %25 : vector<16x32xf32> to vector<16x32xbf16>
    %c0_12 = arith.constant 0 : index
    %c0_13 = arith.constant 0 : index
    %28 = vector.load %arg4[%c0_12, %c0_13] : memref<32x96xbf16, #tpu.memory_space<vmem>>, vector<32x96xbf16>
    %cst_14 = arith.constant dense<0.000000e+00> : vector<16x96xf32>
    %29 = tpu.matmul %27, %28, %cst_14 {dimension_numbers = #tpu.dot_dimension_numbers<[1], [0], [0], [1], [0, 0, 1, 1], [], []>} : vector<16x32xbf16>, vector<32x96xbf16>, vector<16x96xf32> -> vector<16x96xf32>
    %30 = arith.addf %26, %29 : vector<16x96xf32>
    %c0_15 = arith.constant 0 : index
    %c0_16 = arith.constant 0 : index
    %31 = vector.load %arg9[%c0_15, %c0_16] : memref<16x96xf32, #tpu.memory_space<vmem>>, vector<16x96xf32>
    tpu.vector_store %arg9[%c0_15, %c0_16], %30 {strides = array<i32>} : memref<16x96xf32, #tpu.memory_space<vmem>>, vector<16x96xf32>,
    %c0_i32_17 = arith.constant 0 : i32
    %32 = arith.cmpi eq, %arg2, %c0_i32_17 : i32
    %33 = arith.extui %32 : i1 to i32
    %c0_i32_18 = arith.constant 0 : i32
    %34 = arith.cmpi ne, %33, %c0_i32_18 : i32
    scf.if %34 {
      %c0_19 = arith.constant 0 : index
      %c0_20 = arith.constant 0 : index
      %35 = vector.load %arg9[%c0_19, %c0_20] : memref<16x96xf32, #tpu.memory_space<vmem>>, vector<16x96xf32>
      %c0_21 = arith.constant 0 : index
      %c0_22 = arith.constant 0 : index
      %36 = vector.load %arg5[%c0_21, %c0_22] : memref<1x96xf32, #tpu.memory_space<vmem>>, vector<1x96xf32>
      %37 = vector.broadcast %36 : vector<1x96xf32> to vector<16x96xf32>
      %38 = arith.addf %35, %37 : vector<16x96xf32>
      %39 = arith.truncf %38 : vector<16x96xf32> to vector<16x96xbf16>
      %c0_23 = arith.constant 0 : index
      %c0_24 = arith.constant 0 : index
      %40 = vector.load %arg8[%c0_23, %c0_24] : memref<16x96xbf16, #tpu.memory_space<vmem>>, vector<16x96xbf16>
      tpu.vector_store %arg8[%c0_23, %c0_24], %39 {strides = array<i32>} : memref<16x96xbf16, #tpu.memory_space<vmem>>, vector<16x96xbf16>,
    } else {
    }
    return
  }
  func.func @transform_0(%arg0: i32, %arg1: i32, %arg2: i32) -> (i32, i32) {
    %c0_i32 = arith.constant 0 : i32
    return %arg0, %arg2 : i32, i32
  }
  func.func @transform_1(%arg0: i32, %arg1: i32, %arg2: i32) -> (i32, i32) {
    %c0_i32 = arith.constant 0 : i32
    return %arg2, %arg1 : i32, i32
  }
  func.func @transform_2(%arg0: i32, %arg1: i32, %arg2: i32) -> (i32, i32) {
    %c0_i32 = arith.constant 0 : i32
    %c0_i32_0 = arith.constant 0 : i32
    return %c0_i32, %arg1 : i32, i32
  }
  func.func @transform_3(%arg0: i32, %arg1: i32, %arg2: i32) -> (i32, i32) {
    %c0_i32 = arith.constant 0 : i32
    %c0_i32_0 = arith.constant 0 : i32
    return %c0_i32, %arg2 : i32, i32
  }
  func.func @transform_4(%arg0: i32, %arg1: i32, %arg2: i32) -> (i32, i32) {
    %c0_i32 = arith.constant 0 : i32
    %c0_i32_0 = arith.constant 0 : i32
    return %c0_i32, %arg2 : i32, i32
  }
  func.func @transform_5(%arg0: i32, %arg1: i32, %arg2: i32) -> (i32, i32) {
    %c0_i32 = arith.constant 0 : i32
    return %arg0, %arg1 : i32, i32
  }
}

</mosaic_0001>

<bundles_post_ra>
// kernel: tpu_custom_call.1
= control target key start
LH: loop header
LB: loop body
LE: loop exit
PB: predicated region body
PF: predicated region fallthrough
CT: control target
= control target key end

     0   :  { %10 = vsyncpa [#allocation4], 0  ;;  %s423_s0 = inlined_call_operand.hbm [shape: f32[16,32], index: 0, kind: input, shape index: {}]   ;;  %s424_s1 = inlined_call_operand.hbm [shape: bf16[32,96], index: 1, kind: input, shape index: {}]   ;;  %s425_s2 = inlined_call_operand.vmem [shape: f32[1,96], index: 2, kind: input, shape index: {}]   ;;  %s426_s3 = inlined_call_operand.vmem [shape: f32[1,32], index: 3, kind: input, shape index: {}]   ;;  %s427_s4 = inlined_call_operand.vmem [shape: f32[1,32], index: 4, kind: input, shape index: {}]   ;;  %s428_s5 = inlined_call_operand.hbm [shape: bf16[16,96], index: 5, kind: output, shape index: {}]  }
   0x1   :  { %11 = vsyncpa [#allocation7], 0 }
   0x2   :  { %12 = vsyncpa [#allocation5], 0  ;;  %s324_s18 = smov [#allocation3]   ;;  %s252_s22 = scalar_lea.hbm %s423_s0, 256 }
   0x3   :  { %s18_s19 = sshll.u32 %s324_s18, 4  ;;  %p253_p0 = scmp.ne.s32.totalorder %s423_s0, %s252_s22  ;;  %s19_s19 = int_to_ptr.vmem [resolvable:$true] %s18_s19 }
   0x4   :  { %p256_p1 = scmp.lt.u32.totalorder %s252_s22, %s423_s0 }
   0x6   :  { %p258_p2 = pnand %p256_p1, %p253_p0 }
   0x8   :  { %261 = shalt.err (!%p258_p2)
}
   0x9   :  { %s262_s27 = scalar_lea.vmem %s19_s19, 256  ;;  %p267_p4 = scmp.lt.s32.totalorder %s19_s19, %s19_s19 }
   0xa   :  { %p263_p3 = scmp.ne.s32.totalorder %s19_s19, %s262_s27  ;;  %p268_p5 = scmp.lt.s32.totalorder %s262_s27, %s262_s27 }
   0xc   :  { %p269_p6 = por %p268_p5, %p267_p4 }
   0xe   :  { %p270_p7 = pnand %p269_p6, %p263_p3 }
  0x10   :  { %273 = shalt.err (!%p270_p7)
}
  0x11   :  { %s325_s28 = smov 128   ;;  %s326_s29 = smov 8  }
  0x12   :  { %24 = dma.hbm_to_vmem [thread:$0]  %s423_s0, 256, %s19_s19, [#allocation4], %s325_s28, %s325_s28, %s326_s29  }
  0x13   :  { %s327_s7 = smov [#allocation6]   ;;  %s274_s11 = scalar_lea.hbm %s424_s1, 256 }
  0x14   :  { %s30_s8 = sshll.u32 %s327_s7, 4  ;;  %p275_p8 = scmp.ne.s32.totalorder %s424_s1, %s274_s11  ;;  %s31_s8 = int_to_ptr.vmem [resolvable:$true] %s30_s8 }
  0x15   :  { %p278_p9 = scmp.lt.u32.totalorder %s274_s11, %s424_s1 }
  0x17   :  { %p280_p10 = pnand %p278_p9, %p275_p8 }
  0x19   :  { %283 = shalt.err (!%p280_p10)
}
  0x1a   :  { %s284_s16 = scalar_lea.vmem %s31_s8, 256  ;;  %p289_p12 = scmp.lt.s32.totalorder %s31_s8, %s31_s8 }
  0x1b   :  { %p285_p11 = scmp.ne.s32.totalorder %s31_s8, %s284_s16  ;;  %p290_p13 = scmp.lt.s32.totalorder %s284_s16, %s284_s16 }
  0x1d   :  { %p291_p0 = por %p290_p13, %p289_p12 }
  0x1f   :  { %p292_p1 = pnand %p291_p0, %p285_p11 }
  0x21   :  { %295 = shalt.err (!%p292_p1)
}
  0x22   :  { %s328_s0 = smov 64   ;;  %s329_s17 = smov 4  }
  0x23   :  { %36 = dma.hbm_to_vmem [thread:$0]  %s424_s1, 256, %s31_s8, [#allocation7], %s328_s0, %s328_s0, %s329_s17  }
  0x24   :  { %318 = dma.done.wait [#allocation4], 256  }
  0x25   :  { %319 = vsyncadd [#allocation4], 4294967040 }
  0x26   :  { %320 = dma.done.wait [#allocation7], 256  }
  0x27   :  { %321 = vsyncadd [#allocation7], 4294967040  ;;  %vm59_vm0 = vcmask 261120   ;;  %v57_v0 = vld [vmem:[#allocation3] sm:$0xff]  ;;  %v58_v1 = vld [vmem:[#allocation3 + $0x8] sm:$0xff]  ;;  %vm54_vm1 = vcmask 785408  }
  0x28   :  { %v60_v2 = vsel %vm59_vm0, %v57_v0, 0.0  ;;  %v63_v3 = vsel %vm59_vm0, %v58_v1, 0.0  ;;  %v246_v14 = vld [vmem:[#allocation6] sm:$0xff]   ;;  %v330_v15 = vmov 0.0   ;;  %v247_v16 = vld [vmem:[#allocation6 + $0x8] sm:$0xff]   ;;  %vm331_vm2 = vmmov 0  }
  0x29   :  { %61 = vadd.xlane.f32.xlu0 %v60_v2  ;;  %229 = vmatprep.subr.bf16.mxu0 %v330_v15  ;;  %55 = vst.msk [vmem:[#allocation2] sm:$0xff] %vm54_vm1, %v330_v15  ;;  %56 = vst.msk [vmem:[#allocation2 + $0x8] sm:$0xff] %vm54_vm1, %v330_v15  ;;  %v216_v25 = vld [vmem:[%s426_s3] ss:$0 sm:$0xff]  ;;  %vm195_vm3 = vcmask 781312   ;;  %s332_s23 = smov [#allocation8]  }
  0x2a   :  { %230 = vmatpush3.bf16.msra.mxu0 %v246_v14  ;;  %233 = vmatprep.mubr.msk.bf16.mxu0 %vm331_vm2, %v330_v15  ;;  %v217_v29 = vld [vmem:[%s427_s4] ss:$0 sm:$0xff]  ;;  %s203_s24 = sshll.u32 %s332_s23, 4  ;;  %s204_s24 = int_to_ptr.vmem [resolvable:$true] %s203_s24 }
  0x2b   :  { %231 = vmatprep.subr.bf16.mxu0 %v330_v15  ;;  %v221_v42 = vld [vmem:[%s425_s2] ss:$0 sm:$0xff]  ;;  %s296_s25 = scalar_lea.vmem %s204_s24, 128  ;;  %p301_p3 = scmp.lt.s32.totalorder %s204_s24, %s204_s24 }
  0x2c   :  { %p297_p2 = scmp.ne.s32.totalorder %s204_s24, %s296_s25  ;;  %p302_p4 = scmp.lt.s32.totalorder %s296_s25, %s296_s25 }
  0x2d   :  { %64 = vadd.xlane.f32.xlu0 %v63_v3 }
  0x2e   :  { %232 = vmatpush3.bf16.msra.mxu0 %v247_v16  ;;  %p303_p5 = por %p302_p4, %p301_p3 }
  0x30   :  { %v105_v34 = vld [vmem:[#allocation2] sm:$0xff]  ;;  %v106_v36 = vld [vmem:[#allocation2 + $0x8] sm:$0xff]  ;;  %p304_p6 = pnand %p303_p5, %p297_p2 }
  0xb6   :  { %v62_v4 = vpop.xlane.xlu0 %61 }
  0xb7   :  { %v67_v5 = vmul.f32 0.03125, %v62_v4 }
  0xb9   :  { %v69_v6 = vsub.f32 %v57_v0, %v67_v5 }
  0xba   :  { %v65_v7 = vpop.xlane.xlu0 %64 }
  0xbb   :  { %v68_v8 = vmul.f32 0.03125, %v65_v7  ;;  %v71_v9 = vmul.f32 %v69_v6, %v69_v6 }
  0xbd   :  { %v70_v10 = vsub.f32 %v58_v1, %v68_v8  ;;  %v73_v11 = vsel %vm59_vm0, %v71_v9, 0.0 }
  0xbe   :  { %74 = vadd.xlane.f32.xlu1 %v73_v11 }
  0xbf   :  { %v72_v12 = vmul.f32 %v70_v10, %v70_v10 }
  0xc1   :  { %v76_v13 = vsel %vm59_vm0, %v72_v12, 0.0 }
  0xc2   :  { %77 = vadd.xlane.f32.xlu1 %v76_v13 }
 0x14b   :  { %v75_v17 = vpop.xlane.xlu1 %74 }
 0x14c   :  { %v79_v18 = vmul.f32 0.03125, %v75_v17 }
 0x14e   :  { %v81_v19 = vadd.f32 1e-05, %v79_v18 }
 0x14f   :  { %v78_v20 = vpop.xlane.xlu1 %77 }
 0x150   :  { %248 = vrsqrt.f32 %v81_v19  ;;  %v80_v21 = vmul.f32 0.03125, %v78_v20 }
 0x152   :  { %v82_v22 = vadd.f32 1e-05, %v80_v21 }
 0x154   :  { %250 = vrsqrt.f32 %v82_v22 }
 0x15a   :  { %v249_v23 = vpop.eup %248 }
 0x15b   :  { %v85_v24 = vmul.f32 %v249_v23, %v69_v6 }
 0x15d   :  { %v94_v28 = vmul.f32 %v216_v25, %v85_v24 }
 0x15e   :  { %v251_v26 = vpop.eup %250 }
 0x15f   :  { %v86_v27 = vmul.f32 %v251_v26, %v70_v10  ;;  %v103_v31 = vadd.f32 %v217_v29, %v94_v28 }
 0x161   :  { %v95_v30 = vmul.f32 %v216_v25, %v86_v27 }
 0x163   :  { %v104_v32 = vadd.f32 %v217_v29, %v95_v30 }
 0x165   :  { %v107_v33 = vpack.c.bf16 %v104_v32, %v103_v31 }
 0x167   :  { %234 = vmatmul.mubr.msk.bf16.vlgmr.msra.gmra.mrb[0].mxu0 %vm59_vm0, %v107_v33 }
 0x23a   :  { %v161_v35 = vpop.f32.mrb[0].mxu0 }
 0x23b   :  { %v168_v37 = vadd.f32 %v161_v35, %v105_v34  ;;  %v235_v38 = vpop.f32.mrb[1].mxu0 }
 0x23c   :  { %v164_v39 = vpop.f32.mrb[2].mxu0 }
 0x23d   :  { %171 = vst.msk [vmem:[#allocation2] sm:$0xff] %vm54_vm1, %v168_v37  ;;  %v169_v40 = vadd.f32 %v164_v39, %v106_v36  ;;  %v236_v41 = vpop.f32.mrb[3].mxu0 }
 0x23f   :  { %172 = vst.msk [vmem:[#allocation2 + $0x8] sm:$0xff] %vm54_vm1, %v169_v40 }
 0x244   :  { %v176_v43 = vld [vmem:[#allocation2] sm:$0xff] }
 0x245   :  { %v185_v44 = vadd.f32 %v221_v42, %v176_v43 }
 0x246   :  { %v177_v45 = vld [vmem:[#allocation2 + $0x8] sm:$0xff] }
 0x247   :  { %v186_v46 = vadd.f32 %v221_v42, %v177_v45  ;;  %v224_v47 = vpack.c.bf16 %v185_v44, %v185_v44 }
 0x249   :  { %v225_v48 = vpack.c.bf16 %v186_v46, %v186_v46  ;;  %196 = vst.msk [vmem:[#allocation8] sm:$0xf] %vm195_vm3, %v224_v47 }
 0x24b   :  { %197 = vst.msk [vmem:[#allocation8 + $0x4] sm:$0xf] %vm195_vm3, %v225_v48 }
 0x24c   :  { %307 = shalt.err (!%p304_p6)
}
 0x24d   :  { %s308_s27 = scalar_lea.hbm %s428_s5, 128 }
 0x24e   :  { %p309_p7 = scmp.ne.s32.totalorder %s428_s5, %s308_s27  ;;  %p312_p8 = scmp.lt.u32.totalorder %s308_s27, %s428_s5 }
 0x250   :  { %p314_p9 = pnand %p312_p8, %p309_p7 }
 0x252   :  { %317 = shalt.err (!%p314_p9)
}
 0x253   :  { %209 = dma.vmem_to_hbm [thread:$0]  %s204_s24, 128, %s428_s5, [#allocation5], %s328_s0, %s328_s0, %s329_s17  }
 0x254   :  { %322 = dma.done.wait [#allocation5], 128  }
 0x255   :  { %323 = vsyncadd [#allocation5], 4294967168 }
 0x256   :  { %213 = vsyncpa [#allocation4], 1 }
 0x257   :  { %214 = vsyncpa [#allocation7], 1 }
 0x258   :  { %215 = vsyncpa [#allocation5], 1 }

</bundles_post_ra>
